<compile_context>
chip_gen: v7x
topology: tpu7x:2x2x1
jax: 0.10.0
libtpu: 0.0.40
codegen_flags: <defaults>
</compile_context>

<pallas_src>
import jax
import jax.numpy as jnp
from jax.experimental import pallas as pl
from jax.experimental.pallas import tpu as pltpu


def _round_up(n, m):
    return ((n + m - 1) // m) * m


def _ordinal_fnn_kernel(x_ref, w1_ref, b1_ref, w2_ref, cbias_ref, out_ref):
    """One batch tile of the forward pass.

    x_ref     : (TILE_B, 36)   input tile, streamed in caller dtype
    w1_ref    : (36, 28)       hidden weight stored (in, out); MXU operand
    b1_ref    : (1, 28)        hidden bias, f32
    w2_ref    : (1, 28)        coral weight row, f32 (VPU operand)
    cbias_ref : (1, K-1)       coral ordinal bias, f32
    out_ref   : (TILE_B, K-1)  logits
    """
    # ---- Layer 1: the only matmul worth the MXU (36 -> 28). ------------------
    # Cast the streamed operand to the MXU dtype inside the kernel (VPU has
    # slack here; avoids an extra wrapper-side HBM pass over x). f32 accumulate.
    x = x_ref[...].astype(w1_ref.dtype)
    h = jnp.dot(x, w1_ref[...], preferred_element_type=jnp.float32)
    h = jnp.maximum(h + b1_ref[...], 0.0)                      # f32, VPU

    # ---- Coral layer (28 -> 1) on VPU + XLU, NOT the MXU. --------------------
    # At N=K-1=4 the MXU would run at <0.2% utilization yet issue as many
    # vmatmul pushes as layer 1; multiply + lane reduction uses units with
    # slack and roughly halves the work in the binding MXU slot.
    score = jnp.sum(h * w2_ref[...], axis=-1, keepdims=True)   # (TILE_B, 1) f32

    # Ordinal-bias broadcast add (TILE_B,1) + (1,K-1) on the VPU.
    out_ref[...] = (score + cbias_ref[...]).astype(out_ref.dtype)


def ordinal_classifier_fnn(x, w1, b1, w2, coral_bias, *,
                           tile_b=4096,
                           compute_dtype=jnp.bfloat16,
                           out_dtype=jnp.float32,
                           vmem_limit_bytes=32 * 1024 * 1024):
    """Forward pass.

    x          : (B, 36) input (f32 or bf16; streamed as-is, no wrapper copy)
    w1         : (36, 28) hidden weight stored (in, out) == torch weight.T
    b1         : (28,)   hidden bias
    w2         : (28, 1) coral weight (torch weight.T)
    coral_bias : (K-1,)  ordinal bias
    Returns logits of shape (B, K-1) in `out_dtype` (default f32, matching the
    PyTorch module; bf16 is the lane-sparse-store fallback).

    compute_dtype controls only the MXU operands (x cast in-kernel, W1 cast at
    the wrapper boundary -- W1 is tiny and resident).  Accumulation and all
    elementwise math stay f32.
    """
    B, d_in = x.shape
    H = w1.shape[1]
    k_minus_1 = int(coral_bias.shape[0])

    # Resident operands are tiny: cast them freely.  x is deliberately NOT cast
    # or padded here (each would be a full extra HBM pass over the big input).
    w1_c = w1.astype(compute_dtype)
    b1_2d = b1.reshape(1, H).astype(jnp.float32)
    w2_row = w2.reshape(1, H).astype(jnp.float32)
    cb_2d = coral_bias.reshape(1, k_minus_1).astype(jnp.float32)

    # Batch tile: sublane-aligned for x's dtype; prefer >= 2 tiles when the
    # batch allows so ("parallel",) gives both v7x TensorCores work.  Ragged
    # tails are handled by Pallas' partial last block (OOB rows are masked on
    # writeback), not by padding x.
    sublane = max(8, 32 // jnp.dtype(x.dtype).itemsize)        # f32: 8, bf16: 16
    tile_b = max(sublane, min(tile_b, _round_up(pl.cdiv(B, 2), sublane)))
    num_tiles = pl.cdiv(B, tile_b)

    x_item = jnp.dtype(x.dtype).itemsize
    out_item = jnp.dtype(out_dtype).itemsize
    flops = 2 * B * H * (d_in + 1)                             # layer1 + coral
    bytes_accessed = (B * d_in * x_item                        # stream x in
                      + B * k_minus_1 * out_item               # stream logits out
                      + d_in * H * jnp.dtype(compute_dtype).itemsize
                      + (2 * H + k_minus_1) * 4)               # b1, w2, coral_bias

    return pl.pallas_call(
        _ordinal_fnn_kernel,
        out_shape=jax.ShapeDtypeStruct((B, k_minus_1), out_dtype),
        grid=(num_tiles,),
        in_specs=[
            pl.BlockSpec((tile_b, d_in), lambda i: (i, 0)),    # x : tiled over batch
            pl.BlockSpec((d_in, H), lambda i: (0, 0)),         # w1: resident
            pl.BlockSpec((1, H), lambda i: (0, 0)),            # b1: resident
            pl.BlockSpec((1, H), lambda i: (0, 0)),            # w2: resident
            pl.BlockSpec((1, k_minus_1), lambda i: (0, 0)),    # coral bias: resident
        ],
        out_specs=pl.BlockSpec((tile_b, k_minus_1), lambda i: (i, 0)),
        compiler_params=pltpu.CompilerParams(
            dimension_semantics=("parallel",),
            vmem_limit_bytes=vmem_limit_bytes),
        cost_estimate=pl.CostEstimate(flops=flops, transcendentals=0,
                                      bytes_accessed=bytes_accessed),
    )(x, w1_c, b1_2d, w2_row, cb_2d)


def init_params(key, num_classes, layer_sizes=(36, 28)):
    """Deterministic init mimicking nn.Linear's uniform(-1/sqrt(fan_in), ...)."""
    k1, k2, k3 = jax.random.split(key, 3)
    fan_in1 = layer_sizes[0]
    bound1 = 1.0 / jnp.sqrt(fan_in1)
    # stored as (in, out) == torch weight transposed
    w1 = jax.random.uniform(k1, (layer_sizes[0], layer_sizes[1]),
                            jnp.float32, -bound1, bound1)
    b1 = jax.random.uniform(k2, (layer_sizes[1],), jnp.float32, -bound1, bound1)

    fan_in2 = layer_sizes[1]
    bound2 = 1.0 / jnp.sqrt(fan_in2)
    w2 = jax.random.uniform(k3, (layer_sizes[1], 1), jnp.float32, -bound2, bound2)

    # coral_bias = arange(num_classes-1, 0, -1) / (num_classes-1)
    coral_bias = (jnp.arange(num_classes - 1, 0, -1).astype(jnp.float32)
                  / (num_classes - 1))
    return w1, b1, w2, coral_bias


def reference_forward(x, w1, b1, w2, coral_bias):
    h = jnp.maximum(x @ w1 + b1, 0.0)
    return (h @ w2) + coral_bias[None, :]


if __name__ == "__main__":
    num_classes = 5
    layer_sizes = (36, 28)

    key = jax.random.PRNGKey(0)
    k_params, k_x1, k_x2 = jax.random.split(key, 3)
    w1, b1, w2, coral_bias = init_params(k_params, num_classes, layer_sizes)

    # --- small, tile-exact batch; f32 MXU path: near bit-exact vs reference ---
    batch = 8
    x = jax.random.normal(k_x1, (batch, layer_sizes[0]), jnp.float32)
    ref = reference_forward(x, w1, b1, w2, coral_bias)

    logits_f32 = ordinal_classifier_fnn(x, w1, b1, w2, coral_bias,
                                        compute_dtype=jnp.float32)
    logits_f32 = jax.block_until_ready(logits_f32)
    assert logits_f32.shape == (batch, num_classes - 1)
    assert jnp.allclose(logits_f32, ref, atol=1e-5, rtol=1e-5)

    # --- ragged batch (exercises the partial last block), default bf16 MXU ---
    batch_r = 37
    x_r = jax.random.normal(k_x2, (batch_r, layer_sizes[0]), jnp.float32)
    ref_r = reference_forward(x_r, w1, b1, w2, coral_bias)

    logits_bf16 = ordinal_classifier_fnn(x_r, w1, b1, w2, coral_bias,
                                         compute_dtype=jnp.bfloat16)
    logits_bf16 = jax.block_until_ready(logits_bf16)
    assert logits_bf16.shape == (batch_r, num_classes - 1)
    assert jnp.allclose(logits_bf16, ref_r, atol=5e-2, rtol=5e-2)

    print("KERNEL_OK")
</pallas_src>

<mosaic_0001>
module attributes {stable_mosaic.version = 11 : i64} {
  func.func @_ordinal_fnn_kernel(%arg0: i32, %arg1: memref<8x36xf32, #tpu.memory_space<vmem>>, %arg2: memref<36x28xf32, #tpu.memory_space<vmem>>, %arg3: memref<1x28xf32, #tpu.memory_space<vmem>>, %arg4: memref<1x28xf32, #tpu.memory_space<vmem>>, %arg5: memref<1x4xf32, #tpu.memory_space<vmem>>, %arg6: memref<8x4xf32, #tpu.memory_space<vmem>>) attributes {dimension_semantics = [#tpu.dimension_semantics<parallel>], iteration_bounds = array<i64: 1>, scalar_prefetch = 0 : i64, scratch_operands = 0 : i64, tpu.core_type = #tpu.core_type<tc>, window_params = [{transform_indices = @transform_0, window_bounds = array<i64: 8, 36>}, {pipeline_mode = #tpu.pipeline_mode<synchronous>, transform_indices = @transform_1, window_bounds = array<i64: 36, 28>}, {pipeline_mode = #tpu.pipeline_mode<synchronous>, transform_indices = @transform_2, window_bounds = array<i64: 1, 28>}, {pipeline_mode = #tpu.pipeline_mode<synchronous>, transform_indices = @transform_3, window_bounds = array<i64: 1, 28>}, {pipeline_mode = #tpu.pipeline_mode<synchronous>, transform_indices = @transform_4, window_bounds = array<i64: 1, 4>}, {transform_indices = @transform_5, window_bounds = array<i64: 8, 4>}]} {
    %c0 = arith.constant 0 : index
    %c0_0 = arith.constant 0 : index
    %0 = vector.load %arg1[%c0, %c0_0] : memref<8x36xf32, #tpu.memory_space<vmem>>, vector<8x36xf32>
    %c0_1 = arith.constant 0 : index
    %c0_2 = arith.constant 0 : index
    %1 = vector.load %arg2[%c0_1, %c0_2] : memref<36x28xf32, #tpu.memory_space<vmem>>, vector<36x28xf32>
    %cst = arith.constant dense<0.000000e+00> : vector<8x28xf32>
    %2 = tpu.matmul %0, %1, %cst {dimension_numbers = #tpu.dot_dimension_numbers<[1], [0], [0], [1], [0, 0, 1, 1], [], []>} : vector<8x36xf32>, vector<36x28xf32>, vector<8x28xf32> -> vector<8x28xf32>
    %c0_3 = arith.constant 0 : index
    %c0_4 = arith.constant 0 : index
    %3 = vector.load %arg3[%c0_3, %c0_4] : memref<1x28xf32, #tpu.memory_space<vmem>>, vector<1x28xf32>
    %4 = vector.broadcast %3 : vector<1x28xf32> to vector<8x28xf32>
    %5 = arith.addf %2, %4 : vector<8x28xf32>
    %cst_5 = arith.constant 0.000000e+00 : f32
    %6 = vector.broadcast %cst_5 : f32 to vector<8x28xf32>
    %7 = arith.maximumf %5, %6 : vector<8x28xf32>
    %c0_6 = arith.constant 0 : index
    %c0_7 = arith.constant 0 : index
    %8 = vector.load %arg4[%c0_6, %c0_7] : memref<1x28xf32, #tpu.memory_space<vmem>>, vector<1x28xf32>
    %9 = vector.broadcast %8 : vector<1x28xf32> to vector<8x28xf32>
    %10 = arith.mulf %7, %9 : vector<8x28xf32>
    %cst_8 = arith.constant dense<0.000000e+00> : vector<8xf32>
    %11 = vector.multi_reduction <add>, %10, %cst_8 [1] : vector<8x28xf32> to vector<8xf32>
    %12 = vector.shape_cast %11 : vector<8xf32> to vector<8x1xf32>
    %c0_9 = arith.constant 0 : index
    %c0_10 = arith.constant 0 : index
    %13 = vector.load %arg5[%c0_9, %c0_10] : memref<1x4xf32, #tpu.memory_space<vmem>>, vector<1x4xf32>
    %14 = vector.broadcast %12 : vector<8x1xf32> to vector<8x4xf32>
    %15 = vector.broadcast %13 : vector<1x4xf32> to vector<8x4xf32>
    %16 = arith.addf %14, %15 : vector<8x4xf32>
    %c0_11 = arith.constant 0 : index
    %c0_12 = arith.constant 0 : index
    %17 = vector.load %arg6[%c0_11, %c0_12] : memref<8x4xf32, #tpu.memory_space<vmem>>, vector<8x4xf32>
    tpu.vector_store %arg6[%c0_11, %c0_12], %16 {strides = array<i32>} : memref<8x4xf32, #tpu.memory_space<vmem>>, vector<8x4xf32>,
    return
  }
  func.func @transform_0(%arg0: i32) -> (i32, i32) {
    %c0_i32 = arith.constant 0 : i32
    %c0_i32_0 = arith.constant 0 : i32
    return %arg0, %c0_i32 : i32, i32
  }
  func.func @transform_1(%arg0: i32) -> (i32, i32) {
    %c0_i32 = arith.constant 0 : i32
    %c0_i32_0 = arith.constant 0 : i32
    %c0_i32_1 = arith.constant 0 : i32
    return %c0_i32, %c0_i32_0 : i32, i32
  }
  func.func @transform_2(%arg0: i32) -> (i32, i32) {
    %c0_i32 = arith.constant 0 : i32
    %c0_i32_0 = arith.constant 0 : i32
    %c0_i32_1 = arith.constant 0 : i32
    return %c0_i32, %c0_i32_0 : i32, i32
  }
  func.func @transform_3(%arg0: i32) -> (i32, i32) {
    %c0_i32 = arith.constant 0 : i32
    %c0_i32_0 = arith.constant 0 : i32
    %c0_i32_1 = arith.constant 0 : i32
    return %c0_i32, %c0_i32_0 : i32, i32
  }
  func.func @transform_4(%arg0: i32) -> (i32, i32) {
    %c0_i32 = arith.constant 0 : i32
    %c0_i32_0 = arith.constant 0 : i32
    %c0_i32_1 = arith.constant 0 : i32
    return %c0_i32, %c0_i32_0 : i32, i32
  }
  func.func @transform_5(%arg0: i32) -> (i32, i32) {
    %c0_i32 = arith.constant 0 : i32
    %c0_i32_0 = arith.constant 0 : i32
    return %arg0, %c0_i32 : i32, i32
  }
}

</mosaic_0001>

<bundles_post_ra>
// kernel: tpu_custom_call.1
= control target key start
LH: loop header
LB: loop body
LE: loop exit
PB: predicated region body
PF: predicated region fallthrough
CT: control target
= control target key end

     0   :  { %v171_v0 = vmov 0.0|0.0   ;;  %vm172_vm0 = vmmov 0   ;;  %v173_v4 = vmov 0.0   ;;  %vm37_vm1 = vcmask 1043456   ;;  %s234_s1 = inlined_call_operand.vmem [shape: f32[36,28], index: 1, kind: input, shape index: {}]   ;;  %s235_s0 = inlined_call_operand.vmem [shape: f32[8,36], index: 0, kind: input, shape index: {}]   ;;  %s236_s2 = inlined_call_operand.vmem [shape: f32[1,28], index: 2, kind: input, shape index: {}]   ;;  %s237_s3 = inlined_call_operand.vmem [shape: f32[1,28], index: 3, kind: input, shape index: {}]   ;;  %s238_s4 = inlined_call_operand.vmem [shape: f32[1,4], index: 4, kind: input, shape index: {}]   ;;  %s239_s5 = inlined_call_operand.vmem [shape: f32[8,4], index: 5, kind: output, shape index: {}]  }
   0x1   :  { %162 = vmatprep.subr.bf16.mxu0 %v171_v0  ;;  %v21_v1 = vld [vmem:[%s234_s1] sm:$0xff]  ;;  %v22_v2 = vld [vmem:[%s234_s1 + $0x8] sm:$0xff]  ;;  %v23_v3 = vld [vmem:[%s234_s1 + $0x10] sm:$0xff]  ;;  %159 = vmatprep.mubr.msk.f32.mxu0 %vm172_vm0, %v173_v4  ;;  %vm33_vm2 = vcmask 293888   ;;  %vm120_vm3 = vcmask 228352   ;;  %vm132_vm4 = vcmask 31744  }
   0x2   :  { %v163_v5 = vpack.c.bf16 %v22_v2, %v21_v1  ;;  %v24_v6 = vld [vmem:[%s234_s1 + $0x18] sm:$0xff]  ;;  %v25_v8 = vld [vmem:[%s234_s1 + $0x20] sm:$0xf] }
   0x3   :  { %v166_v7 = vpack.c.bf16 %v24_v6, %v23_v3  ;;  %v20_v9 = vld [vmem:[%s235_s0] sm:$0xff] }
   0x4   :  { %164 = vmatpush3.bf16.msra.mxu0 %v163_v5  ;;  %v138_v10 = vld [vmem:[%s236_s2] ss:$0 sm:$0xff] }
   0x5   :  { %165 = vmatprep.subr.bf16.mxu0 %v171_v0  ;;  %v141_v14 = vld [vmem:[%s237_s3] ss:$0 sm:$0xff] }
   0x6   :  { %v142_v18 = vld [vmem:[%s238_s4] ss:$0 sm:$0xff] }
   0x8   :  { %167 = vmatpush3.bf16.msra.mxu0 %v166_v7 }
   0x9   :  { %157 = vmatprep.subr.mxu0 %v173_v4 }
   0xc   :  { %158 = vmatpush3.msk.msra.mxu0 %vm37_vm1, %v25_v8 }
   0xd   :  { %160 = vmatmul.mubr.msk.f32.vlgmr.msra.gmra.mrb[0].mxu0 %vm33_vm2, %v20_v9 }
  0xe0   :  { %v107_v11 = vpop.f32.mrb[0].mxu0 }
  0xe1   :  { %v108_v12 = vadd.f32 %v138_v10, %v107_v11  ;;  %v161_v13 = vpop.f32.mrb[1].mxu0 }
  0xe3   :  { %v111_v15 = vmax.f32 %v108_v12, 0.0 }
  0xe5   :  { %v119_v16 = vmul.f32 %v141_v14, %v111_v15 }
  0xe7   :  { %v121_v17 = vsel %vm120_vm3, %v119_v16, 0.0 }
  0xe8   :  { %122 = vadd.xlane.f32.xlu0 %v121_v17 }
 0x175   :  { %v123_v19 = vpop.xlane.xlu0 %122 }
 0x176   :  { %v131_v20 = vadd.f32 %v142_v18, %v123_v19 }
 0x178   :  { %133 = vst.msk [vmem:[%s239_s5] sm:$0xff] %vm132_vm4, %v131_v20 }

</bundles_post_ra>
